<compile_context>
chip_gen: v5e
topology: v5e:2x2
jax: 0.10.0
libtpu: 0.0.40
codegen_flags: <defaults>
</compile_context>

<pallas_src>
import functools

import jax
import jax.numpy as jnp
import numpy as np
from jax.experimental import pallas as pl
from jax.experimental.pallas import tpu as pltpu

_LANES = 128


def _focal_kernel(x_ref, lab_ref, out_ref, *, n_classes, alpha, gamma,
                  hw, rows, masked):
    x = x_ref[0].astype(jnp.float32)          # (C, R, 128) logits
    lab = lab_ref[0, 0]                       # (R, 128) int32 labels

    # log-softmax pieces over the small, static class axis (elementwise vreg ops)
    m = jnp.max(x, axis=0)                    # (R, 128)
    z = jnp.exp(x - m[None])                  # (C, R, 128)
    sum_z = jnp.sum(z, axis=0)                # (R, 128)

    # gather at the label class via one-hot select (C tiny & static)
    cls = jax.lax.broadcasted_iota(jnp.int32, x.shape, 0)        # (C, R, 128)
    onehot = (cls == lab[None]).astype(jnp.float32)              # (C, R, 128)
    x_lab = jnp.sum(x * onehot, axis=0)       # logit at label
    z_lab = jnp.sum(z * onehot, axis=0)       # exp(x - m) at label

    logp = x_lab - m - jnp.log(sum_z)         # log p_t  (<= 0)
    p = z_lab / sum_z                         # p_t (reuses z; no extra exp)

    # alpha[label]
    if n_classes == 1:
        a_lab = jnp.full(lab.shape, jnp.float32(alpha[0]))
    elif all(a == alpha[1] for a in alpha[1:]):
        # scalar-alpha construction: one select per pixel
        a_lab = jnp.where(lab == 0, jnp.float32(alpha[0]), jnp.float32(alpha[1]))
    else:
        a_lab = onehot[0] * jnp.float32(alpha[0])
        for c in range(1, n_classes):
            a_lab = a_lab + onehot[c] * jnp.float32(alpha[c])

    loss = -a_lab * ((1.0 - p) ** gamma) * logp                  # (R, 128)

    if masked:
        # zero the contribution of host-side padded pixels
        j = pl.program_id(1)
        row = jax.lax.broadcasted_iota(jnp.int32, lab.shape, 0) + j * rows
        lane = jax.lax.broadcasted_iota(jnp.int32, lab.shape, 1)
        loss = jnp.where(row * _LANES + lane < hw, loss, jnp.float32(0.0))

    # one cross-lane reduce per (large) tile; lane/sublane-aligned full-block store
    out_ref[0, 0] = jnp.broadcast_to(jnp.sum(loss), (8, _LANES))


def focal_loss(preds, labels, alpha=0.25, gamma=2, num_classes=3, size_average=True):
    B, C, H, W = preds.shape
    assert C == num_classes
    hw = H * W

    # alpha vector exactly like the PyTorch __init__
    if isinstance(alpha, (list, tuple)):
        assert len(alpha) == num_classes
        alpha_vec = tuple(float(a) for a in alpha)
    else:
        assert alpha < 1
        alpha_vec = (float(alpha),) + (float(1.0 - alpha),) * (num_classes - 1)

    # keep gamma an int when integral -> integer_pow instead of lax.pow
    gamma_s = int(gamma) if float(gamma) == int(gamma) else float(gamma)

    # ---- sublane-dense repack: pixels -> (rows, 128) lanes ----
    n_rows_raw = -(-hw // _LANES)
    # target ~1 MiB of f32 logits per block; R a multiple of 8, capped for VMEM
    bytes_per_row = C * _LANES * 4
    r_target = max(8, ((1 << 20) // bytes_per_row) // 8 * 8)
    r_target = min(r_target, 2048)
    R = min(r_target, ((n_rows_raw + 7) // 8) * 8)
    n_t = -(-n_rows_raw // R)
    n_rows = n_t * R
    hw_pad = n_rows * _LANES
    masked = hw_pad != hw

    x = preds.reshape(B, C, hw)
    lab = labels.reshape(B, 1, hw).astype(jnp.int32)
    if masked:
        x = jnp.pad(x, ((0, 0), (0, 0), (0, hw_pad - hw)))
        lab = jnp.pad(lab, ((0, 0), (0, 0), (0, hw_pad - hw)))
    x4 = x.reshape(B, C, n_rows, _LANES)       # contiguous, free reshape
    lab4 = lab.reshape(B, 1, n_rows, _LANES)

    kernel = functools.partial(
        _focal_kernel, n_classes=C, alpha=alpha_vec, gamma=gamma_s,
        hw=hw, rows=R, masked=masked)

    out = pl.pallas_call(
        kernel,
        grid=(B, n_t),
        in_specs=[pl.BlockSpec((1, C, R, _LANES), lambda b, j: (b, 0, j, 0)),
                  pl.BlockSpec((1, 1, R, _LANES), lambda b, j: (b, 0, j, 0))],
        out_specs=pl.BlockSpec((1, 1, 8, _LANES), lambda b, j: (b, j, 0, 0)),
        out_shape=jax.ShapeDtypeStruct((B, n_t, 8, _LANES), jnp.float32),
        compiler_params=pltpu.CompilerParams(
            dimension_semantics=("parallel", "parallel")),
    )(x4, lab4)

    loss_sum = jnp.sum(out[:, :, 0, 0])        # per-tile partials -> scalar
    if size_average:
        return loss_sum / jnp.float32(B * hw)
    return loss_sum


def _reference_focal(preds, labels, alpha=0.25, gamma=2, num_classes=3,
                     size_average=True):
    if isinstance(alpha, (list, tuple)):
        alpha_vec = jnp.asarray(alpha, jnp.float32)
    else:
        alpha_vec = jnp.concatenate([
            jnp.asarray([alpha], jnp.float32),
            jnp.full((num_classes - 1,), 1.0 - alpha, jnp.float32)])
    B, C, H, W = preds.shape
    p = jnp.transpose(preds, (0, 2, 3, 1)).reshape(-1, C).astype(jnp.float32)
    lab = labels.reshape(-1).astype(jnp.int32)
    logsm = jax.nn.log_softmax(p, axis=1)
    sm = jnp.exp(logsm)
    idx = jnp.arange(p.shape[0])
    p_t = sm[idx, lab]
    logp_t = logsm[idx, lab]
    a_t = alpha_vec[lab]
    loss = -a_t * (1.0 - p_t) ** gamma * logp_t
    return jnp.mean(loss) if size_average else jnp.sum(loss)


if __name__ == "__main__":
    key = jax.random.PRNGKey(0)
    k1, k2, k3, k4 = jax.random.split(key, 4)

    # case 1: scalar alpha, size_average=True, [B, C, H, W] / [B, H, W]
    B, C, H, W = 2, 3, 16, 16
    preds = jax.random.normal(k1, (B, C, H, W), dtype=jnp.float32)
    labels = jax.random.randint(k2, (B, H, W), 0, C, dtype=jnp.int32)
    loss = jax.block_until_ready(
        focal_loss(preds, labels, alpha=0.25, gamma=2, num_classes=C,
                   size_average=True))
    ref = jax.block_until_ready(
        _reference_focal(preds, labels, alpha=0.25, gamma=2, num_classes=C,
                         size_average=True))
    np.testing.assert_allclose(np.asarray(loss), np.asarray(ref),
                               rtol=1e-4, atol=1e-6)

    # case 2: per-class alpha list, size_average=False, odd spatial size (mask path)
    B2, C2, H2, W2 = 1, 3, 17, 19
    preds2 = jax.random.normal(k3, (B2, C2, H2, W2), dtype=jnp.float32)
    labels2 = jax.random.randint(k4, (B2, H2, W2), 0, C2, dtype=jnp.int32)
    a_list = [0.5, 0.3, 0.2]
    loss2 = jax.block_until_ready(
        focal_loss(preds2, labels2, alpha=a_list, gamma=2, num_classes=C2,
                   size_average=False))
    ref2 = jax.block_until_ready(
        _reference_focal(preds2, labels2, alpha=a_list, gamma=2, num_classes=C2,
                         size_average=False))
    np.testing.assert_allclose(np.asarray(loss2), np.asarray(ref2),
                               rtol=1e-4, atol=1e-5)

    print("KERNEL_OK")
</pallas_src>

<mosaic_0001>
module attributes {stable_mosaic.version = 11 : i64} {
  func.func @_focal_kernel(%arg0: i32, %arg1: i32, %arg2: memref<1x3x8x128xf32, #tpu.memory_space<vmem>>, %arg3: memref<1x1x8x128xi32, #tpu.memory_space<vmem>>, %arg4: memref<1x1x8x128xf32, #tpu.memory_space<vmem>>) attributes {dimension_semantics = [#tpu.dimension_semantics<parallel>, #tpu.dimension_semantics<parallel>], iteration_bounds = array<i64: 2, 1>, scalar_prefetch = 0 : i64, scratch_operands = 0 : i64, tpu.core_type = #tpu.core_type<tc>, window_params = [{transform_indices = @transform_0, window_bounds = array<i64: 1, 3, 8, 128>}, {transform_indices = @transform_1, window_bounds = array<i64: 1, 1, 8, 128>}, {transform_indices = @transform_2, window_bounds = array<i64: 1, 1, 8, 128>}]} {
    %c0 = arith.constant 0 : index
    %c0_0 = arith.constant 0 : index
    %c0_1 = arith.constant 0 : index
    %c0_2 = arith.constant 0 : index
    %0 = vector.load %arg2[%c0, %c0_0, %c0_1, %c0_2] : memref<1x3x8x128xf32, #tpu.memory_space<vmem>>, vector<1x3x8x128xf32>
    %1 = vector.shape_cast %0 : vector<1x3x8x128xf32> to vector<3x8x128xf32>
    %c0_3 = arith.constant 0 : index
    %c0_4 = arith.constant 0 : index
    %c0_5 = arith.constant 0 : index
    %c0_6 = arith.constant 0 : index
    %2 = vector.load %arg3[%c0_3, %c0_4, %c0_5, %c0_6] : memref<1x1x8x128xi32, #tpu.memory_space<vmem>>, vector<1x1x8x128xi32>
    %3 = vector.shape_cast %2 : vector<1x1x8x128xi32> to vector<8x128xi32>
    %cst = arith.constant dense<0xFF800000> : vector<8x128xf32>
    %4 = vector.multi_reduction <maximumf>, %1, %cst [0] : vector<3x8x128xf32> to vector<8x128xf32>
    %5 = vector.shape_cast %4 : vector<8x128xf32> to vector<1x8x128xf32>
    %6 = vector.broadcast %5 : vector<1x8x128xf32> to vector<3x8x128xf32>
    %7 = arith.subf %1, %6 : vector<3x8x128xf32>
    %8 = math.exp %7 : vector<3x8x128xf32>
    %cst_7 = arith.constant dense<0.000000e+00> : vector<8x128xf32>
    %9 = vector.multi_reduction <add>, %8, %cst_7 [0] : vector<3x8x128xf32> to vector<8x128xf32>
    %10 = tpu.iota {dimensions = array<i32: 0>} : vector<3x8x128xi32>
    %11 = vector.shape_cast %3 : vector<8x128xi32> to vector<1x8x128xi32>
    %12 = vector.broadcast %11 : vector<1x8x128xi32> to vector<3x8x128xi32>
    %13 = arith.cmpi eq, %10, %12 : vector<3x8x128xi32>
    %14 = arith.extui %13 : vector<3x8x128xi1> to vector<3x8x128xi32>
    %15 = arith.sitofp %14 : vector<3x8x128xi32> to vector<3x8x128xf32>
    %16 = arith.mulf %1, %15 : vector<3x8x128xf32>
    %cst_8 = arith.constant dense<0.000000e+00> : vector<8x128xf32>
    %17 = vector.multi_reduction <add>, %16, %cst_8 [0] : vector<3x8x128xf32> to vector<8x128xf32>
    %18 = arith.mulf %8, %15 : vector<3x8x128xf32>
    %cst_9 = arith.constant dense<0.000000e+00> : vector<8x128xf32>
    %19 = vector.multi_reduction <add>, %18, %cst_9 [0] : vector<3x8x128xf32> to vector<8x128xf32>
    %20 = arith.subf %17, %4 : vector<8x128xf32>
    %21 = math.log %9 : vector<8x128xf32>
    %22 = arith.subf %20, %21 : vector<8x128xf32>
    %23 = arith.divf %19, %9 : vector<8x128xf32>
    %c0_i32 = arith.constant 0 : i32
    %24 = vector.broadcast %c0_i32 : i32 to vector<8x128xi32>
    %25 = arith.cmpi eq, %3, %24 : vector<8x128xi32>
    %cst_10 = arith.constant 2.500000e-01 : f32
    %cst_11 = arith.constant 7.500000e-01 : f32
    %26 = vector.broadcast %cst_10 : f32 to vector<8x128xf32>
    %27 = vector.broadcast %cst_11 : f32 to vector<8x128xf32>
    %28 = arith.select %25, %26, %27 : vector<8x128xi1>, vector<8x128xf32>
    %cst_12 = arith.constant 0.000000e+00 : f32
    %29 = vector.broadcast %cst_12 : f32 to vector<8x128xf32>
    %30 = arith.subf %29, %28 : vector<8x128xf32>
    %cst_13 = arith.constant 1.000000e+00 : f32
    %31 = vector.broadcast %cst_13 : f32 to vector<8x128xf32>
    %32 = arith.subf %31, %23 : vector<8x128xf32>
    %33 = arith.mulf %32, %32 : vector<8x128xf32>
    %34 = arith.mulf %30, %33 : vector<8x128xf32>
    %35 = arith.mulf %34, %22 : vector<8x128xf32>
    %36 = tpu.iota {dimensions = array<i32: 0>} : vector<8x128xi32>
    %c8_i32 = arith.constant 8 : i32
    %37 = arith.muli %arg1, %c8_i32 : i32
    %38 = vector.broadcast %37 : i32 to vector<8x128xi32>
    %39 = arith.addi %36, %38 : vector<8x128xi32>
    %40 = tpu.iota {dimensions = array<i32: 1>} : vector<8x128xi32>
    %c128_i32 = arith.constant 128 : i32
    %41 = vector.broadcast %c128_i32 : i32 to vector<8x128xi32>
    %42 = arith.muli %39, %41 : vector<8x128xi32>
    %43 = arith.addi %42, %40 : vector<8x128xi32>
    %c256_i32 = arith.constant 256 : i32
    %44 = vector.broadcast %c256_i32 : i32 to vector<8x128xi32>
    %45 = arith.cmpi slt, %43, %44 : vector<8x128xi32>
    %cst_14 = arith.constant 0.000000e+00 : f32
    %46 = vector.broadcast %cst_14 : f32 to vector<8x128xf32>
    %47 = arith.select %45, %35, %46 : vector<8x128xi1>, vector<8x128xf32>
    %48 = vector.shape_cast %47 : vector<8x128xf32> to vector<1x8x128xf32>
    %cst_15 = arith.constant dense<0.000000e+00> : vector<1xf32>
    %49 = vector.multi_reduction <add>, %48, %cst_15 [1, 2] : vector<1x8x128xf32> to vector<1xf32>
    %50 = vector.shape_cast %49 : vector<1xf32> to vector<1x1x1xf32>
    %51 = vector.extract %50[0, 0, 0] : f32 from vector<1x1x1xf32>
    %52 = vector.broadcast %51 : f32 to vector<8x128xf32>
    %c0_16 = arith.constant 0 : index
    %c0_17 = arith.constant 0 : index
    %c0_18 = arith.constant 0 : index
    %c0_19 = arith.constant 0 : index
    %53 = vector.load %arg4[%c0_16, %c0_17, %c0_18, %c0_19] : memref<1x1x8x128xf32, #tpu.memory_space<vmem>>, vector<1x1x8x128xf32>
    %54 = vector.shape_cast %53 : vector<1x1x8x128xf32> to vector<8x128xf32>
    %55 = vector.shape_cast %52 : vector<8x128xf32> to vector<1x1x8x128xf32>
    tpu.vector_store %arg4[%c0_16, %c0_17, %c0_18, %c0_19], %55 {strides = array<i32>} : memref<1x1x8x128xf32, #tpu.memory_space<vmem>>, vector<1x1x8x128xf32>,
    return
  }
  func.func @transform_0(%arg0: i32, %arg1: i32) -> (i32, i32, i32, i32) {
    %c0_i32 = arith.constant 0 : i32
    %c0_i32_0 = arith.constant 0 : i32
    %c0_i32_1 = arith.constant 0 : i32
    return %arg0, %c0_i32, %arg1, %c0_i32_0 : i32, i32, i32, i32
  }
  func.func @transform_1(%arg0: i32, %arg1: i32) -> (i32, i32, i32, i32) {
    %c0_i32 = arith.constant 0 : i32
    %c0_i32_0 = arith.constant 0 : i32
    %c0_i32_1 = arith.constant 0 : i32
    return %arg0, %c0_i32, %arg1, %c0_i32_0 : i32, i32, i32, i32
  }
  func.func @transform_2(%arg0: i32, %arg1: i32) -> (i32, i32, i32, i32) {
    %c0_i32 = arith.constant 0 : i32
    %c0_i32_0 = arith.constant 0 : i32
    %c0_i32_1 = arith.constant 0 : i32
    return %arg0, %arg1, %c0_i32, %c0_i32_0 : i32, i32, i32, i32
  }
}

</mosaic_0001>

<bundles_post_ra>
// kernel: tpu_custom_call.1
= control target key start
LH: loop header
LB: loop body
LE: loop exit
PB: predicated region body
PF: predicated region fallthrough
CT: control target
= control target key end

     0   :  { %7 = vsyncpa [#allocation3], 0  ;;  %s848_s0 = inlined_call_operand.hbm [shape: f32[2,3,8,128], index: 0, kind: input, shape index: {}]   ;;  %s849_s1 = inlined_call_operand.hbm [shape: s32[2,1,8,128], index: 1, kind: input, shape index: {}]   ;;  %s850_s2 = inlined_call_operand.hbm [shape: f32[2,1,8,128], index: 2, kind: output, shape index: {}]  }
   0x1   :  { %9 = vsyncpa [#allocation3 + $0x1], 0 }
   0x2   :  { %10 = vsyncpa [#allocation6], 0 }
   0x3   :  { %12 = vsyncpa [#allocation6 + $0x1], 0 }
   0x4   :  { %13 = vsyncpa [#allocation4], 0 }
   0x5   :  { %15 = vsyncpa [#allocation4 + $0x1], 0  ;;  %s698_s9 = smov 0   ;;  %s700_s10 = smov 0  }
   0x6   :  { %s702_s11 = smov 0   ;;  %s704_s12 = smov 0  }
   0x7   :  { %s706_s13 = smov 0   ;;  %s708_s14 = smov 0  }
   0x8 LB: > { %s428_s15 = sadd.s32 4294967295, %s677_s14   ;;  %s429_s16 = sadd.s32 4294967294, %s677_s14   ;;  %s677_s14 = sphi %s708_s14, %s21_s14   ;;  %s673_s13 = sphi %s706_s13, %s860_s13   ;;  %s669_s12 = sphi %s704_s12, %s859_s12   ;;  %s665_s11 = sphi %s702_s11, %s858_s11   ;;  %s661_s10 = sphi %s700_s10, %s857_s10   ;;  %s657_s9 = sphi %s698_s9, %s856_s9  }
   0x9   : > { %s33_s17 = sadd.s32 1, %s673_s13  ;;  %s42_s18 = sadd.s32 1, %s665_s11 }
   0xa   : > { %p35_p0 = scmp.ge.s32.totalorder %s33_s17, 2  ;;  %p49_p1 = scmp.ne.s32.totalorder %s665_s11, %s661_s10 }
   0xb   : > { %p50_p2 = scmp.eq.s32.totalorder %s677_s14, 0  ;;  %p55_p3 = scmp.ne.s32.totalorder %s661_s10, %s657_s9 }
   0xc   : > { %s862_s17 = smov (%p35_p0, %s33_s17), 0  ;;  %p56_p5 = scmp.eq.s32.totalorder %s428_s15, 0 }
   0xd   : > { %p739_p4 = por %p50_p2, %p49_p1  ;;  %s37_s20 = ssub.s32 %s673_s13, %s862_s17 }
   0xe   : > { %p109_p6 = scmp.eq.s32.totalorder %s428_s15, 1  ;;  %p40_p7 = scmp.eq.s32.totalorder %s37_s20, 0 }
   0xf   : > { %p745_p8 = por %p56_p5, %p55_p3  ;;  %p115_p10 = scmp.eq.s32.totalorder %s429_s16, 1 }
  0x10   : > { %p749_p9 = por %p109_p6, %p49_p1  ;;  %p431_p12 = scmp.ge.s32.totalorder %s677_s14, 2 }
  0x11   : > { %s754_s23 = scalar_select %p40_p7, %s665_s11, %s42_s18  }
  0x12   : > { %p756_p11 = por %p115_p10, %p55_p3  ;;  %p467_p13 = scmp.lt.s32.totalorder %s677_s14, 2 }
  0x13   : > { %s135_s25 = sand.u32 1, %s665_s11   ;;  %s446_s27 = smul.u32 24, %s673_s13 }
  0x14   : > { %s445_s26 = smul.u32 24, %s135_s25  ;;  %p766_p0 = pnand %p467_p13, %p739_p4 }
  0x15   : > { %s145_s3 = scalar_lea.hbm %s848_s0, %s446_s27  ;;  %p435_p1 = scmp.ge.s32.totalorder %s677_s14, 1 }
  0x16   : > { %s139_s4 = scalar_lea.vmem [#allocation2], %s445_s26  ;;  %s146_s6 = sshll.u32 %s145_s3, 4  ;;  %s147_s6 = int_to_ptr.hbm [resolvable:$true] %s146_s6 }
  0x17   : > { %s148_s5 = sshll.u32 %s139_s4, 4  ;;  %s136_s7 = scalar_lea.sflag [#allocation3], %s135_s25  ;;  %s149_s5 = int_to_ptr.vmem [resolvable:$true] %s148_s5 }
  0x18   : > { %s679_s8 = smov 128   ;;  %s680_s15 = smov 8  }
  0x19   : > { %459 = dma.hbm_to_vmem [thread:$0]  (!%p766_p0), %s147_s6, 384, %s149_s5, %s136_s7, %s679_s8, %s679_s8, %s680_s15  }
  0x1a   : > { %p176_p2 = scmp.lt.s32.totalorder %s677_s14, 3  ;;  %s433_s16 = sshll.u32 %s135_s25, 3 }
  0x1b   : > { %s434_s18 = sshll.u32 %s673_s13, 3  ;;  %s162_s26 = scalar_lea.vmem [#allocation5], %s433_s16 }
  0x1c   : > { %p177_p3 = pnand %p435_p1, %p176_p2  ;;  %s167_s27 = scalar_lea.hbm %s849_s1, %s434_s18 }
  0x1d   : > { %s171_s29 = sshll.u32 %s162_s26, 4  ;;  %s169_s30 = sshll.u32 %s167_s27, 4  ;;  %s172_s29 = int_to_ptr.vmem [resolvable:$true] %s171_s29  ;;  %s170_s30 = int_to_ptr.hbm [resolvable:$true] %s169_s30 }
  0x1e   : > { %s159_s3 = scalar_lea.sflag [#allocation6], %s135_s25  ;;  %180 = sbr.rel (%p177_p3) target bundleno = 271 (0x10f), region = 28 }
  0x1f   : > { %462 = dma.hbm_to_vmem [thread:$0]  (!%p766_p0), %s170_s30, 128, %s172_s29, %s159_s3  }
  0x20   : > { %s784_s4 = sand.u32 (!%p177_p3), 1, %s661_s10  }
  0x21   : > { %s447_s5 = smul.u32 (!%p177_p3), 24, %s784_s4  ;;  %s183_s6 = scalar_lea.sflag (!%p177_p3), [#allocation3], %s784_s4 }
  0x23   : > { %s186_s7 = scalar_lea.vmem [#allocation2], %s447_s5 }
  0x24   : > { %644 = dma.done.wait (%p745_p8), %s183_s6, 384  }
  0x25   : > { %646 = vsyncadd (%p745_p8), %s183_s6, 4294966912  ;;  %s436_s25 = sshll.u32 %s784_s4, 3  ;;  %s193_s28 = scalar_lea.sflag [#allocation6], %s784_s4 }
  0x26   : > { %s196_s8 = scalar_lea.vmem [#allocation5], %s436_s25 }
  0x27   : > { %648 = dma.done.wait (%p745_p8), %s193_s28, 128  }
  0x28   : > { %650 = vsyncadd (%p745_p8), %s193_s28, 4294967168  ;;  %v223_v0 = vld [vmem:[%s186_s7] sm:$0xff]  ;;  %v224_v1 = vld [vmem:[%s186_s7 + $0x8] sm:$0xff]  ;;  %v681_v17 = vmov 0.0   ;;  %v284_v29 = vlaneseq  ;;  %v682_v44 = vmov 0.75   ;;  %s442_s21 = sshll.u32 %s669_s12, 3 }
  0x29   : > { %v225_v2 = vld [vmem:[%s186_s7 + $0x10] sm:$0xff]  ;;  %v227_v3 = vmax.f32 %v223_v0, %v224_v1  ;;  %s318_s18 = scalar_lea.hbm %s850_s2, %s442_s21  ;;  %s222_s19 = scalar_lea.vmem [#allocation7], %s436_s25 }
  0x2a   : > { %v226_v14 = vld [vmem:[%s196_s8] sm:$0xff]  ;;  %v285_v38 = vshrl.u32 %v284_v29, 7  ;;  %v290_v46 = vand.u32 127, %v284_v29  ;;  %s320_s20 = sshll.u32 %s222_s19, 4  ;;  %s322_s27 = sshll.u32 %s318_s18, 4  ;;  %s321_s20 = int_to_ptr.vmem [resolvable:$true] %s320_s20  ;;  %s323_s27 = int_to_ptr.hbm [resolvable:$true] %s322_s27 }
  0x2b   : > { %v800_v4 = vmax.f32 %v227_v3, %v225_v2  ;;  %vm240_vm0 = vcmp.eq.s32.totalorder %v226_v14, 0  ;;  %vm241_vm1 = vcmp.eq.s32.totalorder %v226_v14, 1  ;;  %vm242_vm2 = vcmp.eq.s32.totalorder %v226_v14, 2  ;;  %s307_s29 = scalar_lea.sflag [#allocation4], %s784_s4  ;;  %s605_s30 = sshra.s32 %s323_s27, 4  ;;  %s606_s30 = int_to_ptr.hbm [resolvable:$true] %s605_s30 }
  0x2c   : > { %v438_v18 = vsel %vm240_vm0, 1.0, %v681_v17  ;;  %v439_v19 = vsel %vm241_vm1, 1.0, %v681_v17  ;;  %v440_v24 = vsel %vm242_vm2, 1.0, %v681_v17  ;;  %v278_v45 = vsel %vm240_vm0, 0.25, %v682_v44  ;;  %s607_s3 = scalar_lea.hbm %s606_s30, 8  ;;  %s611_s6 = scalar_lea.hbm %s850_s2, 16 }
  0x2d   : > { %v229_v5 = vsub.f32 %v223_v0, %v800_v4  ;;  %v230_v6 = vsub.f32 %v224_v1, %v800_v4  ;;  %v231_v7 = vsub.f32 %v225_v2, %v800_v4  ;;  %v249_v20 = vmul.f32 %v438_v18, %v223_v0  ;;  %p608_p4 = scmp.ne.s32.totalorder %s606_s30, %s607_s3  ;;  %p612_p7 = scmp.lt.s32.totalorder %s606_s30, %s850_s2 }
  0x2e   : > { %v250_v21 = vmul.f32 %v439_v19, %v224_v1  ;;  %v251_v26 = vmul.f32 %v440_v24, %v225_v2  ;;  %v291_v47 = vmul.u32 128, %v285_v38  ;;  %v279_v51 = vsub.f32 0.0, %v278_v45  ;;  %p613_p8 = scmp.lt.s32.totalorder %s611_s6, %s607_s3 }
  0x2f   : > { %v232_v8 = vmul.f32 1.442695, %v229_v5  ;;  %v234_v9 = vmul.f32 1.442695, %v230_v6  ;;  %v236_v10 = vmul.f32 1.442695, %v231_v7  ;;  %p609_p5 = pnand %p608_p4, %p749_p9 }
  0x30   : > { %v252_v27 = vadd.f32 %v250_v21, %v249_v20  ;;  %v292_v53 = vadd.s32 %v291_v47, %v290_v46  ;;  %p614_p10 = por %p613_p8, %p612_p7 }
  0x31   : > { %521 = vpow2.f32 %v232_v8  ;;  %p610_p6 = pneg %p609_p5 }
  0x32   : > { %523 = vpow2.f32 %v234_v9  ;;  %v253_v36 = vadd.f32 %v252_v27, %v251_v26  ;;  %vm293_vm7 = vcmp.lt.s32.totalorder %v292_v53, 256 }
  0x33   : > { %525 = vpow2.f32 %v236_v10  ;;  %p615_p13 = pnand %p614_p10, %p610_p6 }
  0x34   : > { %v259_v48 = vsub.f32 %v253_v36, %v800_v4 }
  0x37   : > { %v522_v11 = vpop.eup %521 }
  0x38   : > { %v524_v12 = vpop.eup %523  ;;  %v254_v22 = vmul.f32 %v522_v11, %v438_v18 }
  0x39   : > { %v526_v13 = vpop.eup %525  ;;  %v238_v15 = vadd.f32 %v524_v12, %v522_v11  ;;  %v255_v23 = vmul.f32 %v524_v12, %v439_v19 }
  0x3a   : > { %v256_v30 = vmul.f32 %v526_v13, %v440_v24 }
  0x3b   : > { %v239_v16 = vadd.f32 %v526_v13, %v238_v15  ;;  %v257_v31 = vadd.f32 %v255_v23, %v254_v22 }
  0x3d   : > { %527 = vrcp.f32 %v239_v16  ;;  %v274_v32 = vand.u32 2147483648, %v239_v16  ;;  %vm268_vm3 = vweird.f32 %v239_v16  ;;  %v272_v34 = vand.u32 2147483647, %v239_v16 }
  0x3e   : > { %529 = vlog2.f32 %v239_v16  ;;  %v258_v39 = vadd.f32 %v257_v31, %v256_v30 }
  0x3f   : > { %v275_v37 = vor.u32 1.1754944e-38, %v274_v32  ;;  %vm273_vm6 = vcmp.eq.f32.partialorder %v272_v34, 8.507059e+37 }
  0x43   : > { %v528_v25 = vpop.eup %527 }
  0x44   : > { %v264_v28 = vmul.f32 %v528_v25, %v239_v16  ;;  %vm269_vm4 = vweird.f32 %v528_v25  ;;  %v530_v41 = vpop.eup %529 }
  0x45   : > { %vm270_vm5 = vmor %vm268_vm3, %vm269_vm4  ;;  %v261_v49 = vmul.f32 0.6931472, %v530_v41 }
  0x46   : > { %v265_v33 = vsub.f32 1.0, %v264_v28 }
  0x47   : > { %v262_v54 = vsub.f32 %v259_v48, %v261_v49 }
  0x48   : > { %v266_v35 = vmul.f32 %v528_v25, %v265_v33 }
  0x4a   : > { %v267_v40 = vadd.f32 %v528_v25, %v266_v35 }
  0x4c   : > { %v271_v42 = vsel %vm270_vm5, %v528_v25, %v267_v40 }
  0x4d   : > { %v276_v43 = vsel %vm273_vm6, %v275_v37, %v271_v42 }
  0x4e   : > { %v277_v50 = vmul.f32 %v276_v43, %v258_v39 }
  0x50   : > { %v280_v52 = vsub.f32 1.0, %v277_v50 }
  0x52   : > { %v281_v55 = vmul.f32 %v280_v52, %v280_v52 }
  0x54   : > { %v282_v56 = vmul.f32 %v281_v55, %v279_v51 }
  0x56   : > { %v283_v57 = vmul.f32 %v282_v56, %v262_v54 }
  0x58   : > { %v294_v58 = vsel %vm293_vm7, %v283_v57, 0.0 }
  0x59   : > { %295 = vadd.xlane.f32.xlu0 %v294_v58 }
  0xcc   : > { %v296_v59 = vpop.xlane.xlu0 %295 }
  0xcd   : > { %v297_v60 = vrot.slane %v296_v59, 4 }
  0xcf   : > { %v298_v61 = vadd.f32 %v297_v60, %v296_v59 }
  0xd1   : > { %v299_v62 = vrot.slane %v298_v61, 2 }
  0xd3   : > { %v300_v63 = vadd.f32 %v299_v62, %v298_v61 }
  0xd5   : > { %v301_v0 = vrot.slane %v300_v63, 1 }
  0xd7   : > { %v302_v1 = vadd.f32 %v301_v0, %v300_v63 }
  0xd9   : > { %448 = vpush %v302_v1 }
 0x10a   : > { %s449_s26 = spop %448 }
 0x10b   : > { %v304_v2 = vstv %s449_s26 }
 0x10c   : > { %305 = vst [vmem:[%s222_s19] sm:$0xff] %v304_v2 }
 0x10d   : > { %618 = shalt.err (!%p615_p13)
}
 0x10e   : > { %454 = dma.vmem_to_hbm [thread:$0]  (%p749_p9), %s321_s20, 128, %s323_s27, %s307_s29  }
 0x10f PF: > { %s334_s4 = sand.u32 1, %s657_s9   ;;  %p464_p0 = pnand %p431_p12, %p756_p11 }
 0x110   : > { %s335_s28 = scalar_lea.sflag [#allocation4], %s334_s4 }
 0x111   : > { %p465_p1 = pneg %p464_p0 }
 0x113   : > { %652 = dma.done.wait (%p465_p1), %s335_s28, 128  }
 0x114   : > { %654 = vsyncadd (%p465_p1), %s335_s28, 4294967168  ;;  %s21_s14 = sadd.s32 1, %s677_s14   ;;  %s856_s9 = smov %s661_s10 }
 0x115   : > { %p18_p2 = scmp.ge.s32.totalorder %s21_s14, 4   ;;  %s857_s10 = smov %s665_s11 }
 0x116   : > { %s858_s11 = smov %s754_s23  ;;  %s859_s12 = smov %s673_s13 }
 0x117   : > { %s860_s13 = smov %s862_s17  ;;  %20 = sbr.rel (!%p18_p2) target bundleno = 8 (0x8), region = 86 }
 0x11c   :  { %341 = vsyncpa [#allocation3], 1 }
 0x11d   :  { %343 = vsyncpa [#allocation3 + $0x1], 1 }
 0x11e   :  { %344 = vsyncpa [#allocation6], 1 }
 0x11f   :  { %346 = vsyncpa [#allocation6 + $0x1], 1 }
 0x120   :  { %347 = vsyncpa [#allocation4], 1 }
 0x121   :  { %349 = vsyncpa [#allocation4 + $0x1], 1 }

</bundles_post_ra>
